<compile_context>
chip_gen: v5e
topology: v5e:2x2
jax: 0.10.0
libtpu: 0.0.40
codegen_flags: <defaults>
</compile_context>

<pallas_src>
import functools

import jax
import jax.numpy as jnp
from jax import lax
from jax.experimental import pallas as pl
from jax.experimental.pallas import tpu as pltpu

ALPHA = 0.8
GAMMA = 2
LANES = 128
SUBLANES = 8
TM = 2048       # rows per tile (1 MiB per f32 input block)
NCORES = 2      # leading "parallel" grid axis (both TCs on v7x; no-op on v5e/v6e)


def _focal_partial_kernel(x_ref, t_ref, o_ref, acc_ref, *, n_valid):
    c = pl.program_id(0)
    s = pl.program_id(1)
    nsteps = pl.num_programs(1)

    @pl.when(s == 0)
    def _():
        acc_ref[...] = jnp.zeros_like(acc_ref)

    x = x_ref[...].astype(jnp.float32)
    t = t_ref[...].astype(jnp.float32)

    # Numerically-stable BCE with logits (matches torch's formulation):
    #   l = max(x, 0) - x*t + log1p(exp(-|x|))
    bce = jnp.maximum(x, 0.0) - x * t + jnp.log1p(jnp.exp(-jnp.abs(x)))

    # Validity mask from the global flat element index. Covers:
    #   - lane padding of the flat array,
    #   - the ragged last row-block,
    #   - clamped (duplicate) blocks on the parallel-core axis.
    tm, lanes = x.shape
    base = (c * nsteps + s) * (tm * lanes)
    row = lax.broadcasted_iota(jnp.int32, (tm, lanes), 0)
    col = lax.broadcasted_iota(jnp.int32, (tm, lanes), 1)
    flat_idx = base + row * lanes + col
    bce = jnp.where(flat_idx < n_valid, bce, 0.0)

    # (TM, 128) -> (8, 128) partial via pure VALU adds (no XLU, no single-lane
    # loop-carried dependency); layout-preserving reshape.
    acc_ref[...] += jnp.sum(bce.reshape(tm // SUBLANES, SUBLANES, lanes), axis=0)

    @pl.when(s == nsteps - 1)
    def _():
        o_ref[0] = acc_ref[...]


@jax.jit
def focal_loss(inputs, targets):
    """inputs, targets: same shape (e.g. NCHW logits / {0,1} targets). Returns scalar f32."""
    assert inputs.shape == targets.shape
    n = inputs.size

    x = inputs.reshape(-1)
    t = targets.reshape(-1)

    # Pad the flat length only up to a multiple of 8*128 so the (rows, 128)
    # reshape and the in-kernel (.., 8, 128) reduction are exact. For typical
    # shapes (n % 1024 == 0) this is a no-op (no HBM copy at all).
    chunk = SUBLANES * LANES
    pad = (-n) % chunk
    if pad:
        x = jnp.pad(x, (0, pad))
        t = jnp.pad(t, (0, pad))
    rows = (n + pad) // LANES

    x2 = x.reshape(rows, LANES)
    t2 = t.reshape(rows, LANES)

    tm = min(TM, rows)                       # both TM and rows are multiples of 8
    nb = (rows + tm - 1) // tm               # number of row-blocks
    steps = (nb + NCORES - 1) // NCORES      # row-blocks handled per core

    def data_map(c, s):
        # Clamp so the auto-DMA never addresses a nonexistent block; the
        # redundant (clamped) blocks are fully zeroed by the in-kernel mask.
        return (jnp.minimum(c * steps + s, nb - 1), 0)

    kernel = functools.partial(_focal_partial_kernel, n_valid=n)

    partials = pl.pallas_call(
        kernel,
        out_shape=jax.ShapeDtypeStruct((NCORES, SUBLANES, LANES), jnp.float32),
        grid_spec=pltpu.PrefetchScalarGridSpec(
            num_scalar_prefetch=0,
            grid=(NCORES, steps),
            in_specs=[
                pl.BlockSpec((tm, LANES), data_map),
                pl.BlockSpec((tm, LANES), data_map),
            ],
            out_specs=pl.BlockSpec((1, SUBLANES, LANES), lambda c, s: (c, 0, 0)),
            scratch_shapes=[pltpu.VMEM((SUBLANES, LANES), jnp.float32)],
        ),
        compiler_params=pltpu.CompilerParams(
            dimension_semantics=("parallel", "arbitrary")),
    )(x2, t2)

    # Tiny scalar epilogue on the 2*8*128 per-core partial sums.
    mean_bce = jnp.sum(partials) / jnp.float32(n)
    return ALPHA * (1.0 - jnp.exp(-mean_bce)) ** GAMMA * mean_bce


def focal_loss_ref(inputs, targets):
    x = inputs.astype(jnp.float32)
    t = targets.astype(jnp.float32)
    bce_el = jnp.maximum(x, 0.0) - x * t + jnp.log1p(jnp.exp(-jnp.abs(x)))
    bce = jnp.mean(bce_el)
    return ALPHA * (1.0 - jnp.exp(-bce)) ** GAMMA * bce


if __name__ == "__main__":
    key = jax.random.PRNGKey(0)
    k1, k2 = jax.random.split(key)
    # Shapes consistent with SAM mask logits: (batch, channels, H, W)
    inputs = jax.random.normal(k1, (2, 4, 16, 16), dtype=jnp.float32)
    targets = (jax.random.uniform(k2, (2, 4, 16, 16)) > 0.5).astype(jnp.float32)

    out = focal_loss(inputs, targets)
    jax.block_until_ready(out)

    ref = focal_loss_ref(inputs, targets)
    assert jnp.allclose(out, ref, rtol=1e-5, atol=1e-6), (out, ref)
    print("KERNEL_OK")
</pallas_src>

<mosaic_0001>
module attributes {stable_mosaic.version = 11 : i64} {
  func.func @_focal_partial_kernel(%arg0: i32, %arg1: i32, %arg2: memref<16x128xf32, #tpu.memory_space<vmem>>, %arg3: memref<16x128xf32, #tpu.memory_space<vmem>>, %arg4: memref<1x8x128xf32, #tpu.memory_space<vmem>>, %arg5: memref<8x128xf32, #tpu.memory_space<vmem>>) attributes {dimension_semantics = [#tpu.dimension_semantics<parallel>, #tpu.dimension_semantics<arbitrary>], iteration_bounds = array<i64: 2, 1>, scalar_prefetch = 0 : i64, scratch_operands = 1 : i64, tpu.core_type = #tpu.core_type<tc>, window_params = [{transform_indices = @transform_0, window_bounds = array<i64: 16, 128>}, {transform_indices = @transform_1, window_bounds = array<i64: 16, 128>}, {transform_indices = @transform_2, window_bounds = array<i64: 1, 8, 128>}]} {
    %c0_i32 = arith.constant 0 : i32
    %0 = arith.cmpi eq, %arg1, %c0_i32 : i32
    %1 = arith.extui %0 : i1 to i32
    %c0_i32_0 = arith.constant 0 : i32
    %2 = arith.cmpi ne, %1, %c0_i32_0 : i32
    scf.if %2 {
      %cst_14 = arith.constant 0.000000e+00 : f32
      %37 = vector.broadcast %cst_14 : f32 to vector<8x128xf32>
      %c0_15 = arith.constant 0 : index
      %c0_16 = arith.constant 0 : index
      %38 = vector.load %arg5[%c0_15, %c0_16] : memref<8x128xf32, #tpu.memory_space<vmem>>, vector<8x128xf32>
      tpu.vector_store %arg5[%c0_15, %c0_16], %37 {strides = array<i32>} : memref<8x128xf32, #tpu.memory_space<vmem>>, vector<8x128xf32>,
    } else {
    }
    %c0 = arith.constant 0 : index
    %c0_1 = arith.constant 0 : index
    %3 = vector.load %arg2[%c0, %c0_1] : memref<16x128xf32, #tpu.memory_space<vmem>>, vector<16x128xf32>
    %c0_2 = arith.constant 0 : index
    %c0_3 = arith.constant 0 : index
    %4 = vector.load %arg3[%c0_2, %c0_3] : memref<16x128xf32, #tpu.memory_space<vmem>>, vector<16x128xf32>
    %cst = arith.constant 0.000000e+00 : f32
    %5 = vector.broadcast %cst : f32 to vector<16x128xf32>
    %6 = arith.maximumf %3, %5 : vector<16x128xf32>
    %7 = arith.mulf %3, %4 : vector<16x128xf32>
    %8 = arith.subf %6, %7 : vector<16x128xf32>
    %9 = math.absf %3 : vector<16x128xf32>
    %cst_4 = arith.constant 0.000000e+00 : f32
    %10 = vector.broadcast %cst_4 : f32 to vector<16x128xf32>
    %11 = arith.subf %10, %9 : vector<16x128xf32>
    %12 = math.exp %11 : vector<16x128xf32>
    %13 = math.log1p %12 : vector<16x128xf32>
    %14 = arith.addf %8, %13 : vector<16x128xf32>
    %c1_i32 = arith.constant 1 : i32
    %15 = arith.muli %arg0, %c1_i32 : i32
    %16 = arith.addi %15, %arg1 : i32
    %c2048_i32 = arith.constant 2048 : i32
    %17 = arith.muli %16, %c2048_i32 : i32
    %18 = tpu.iota {dimensions = array<i32: 0>} : vector<16x128xi32>
    %19 = tpu.iota {dimensions = array<i32: 1>} : vector<16x128xi32>
    %c128_i32 = arith.constant 128 : i32
    %20 = vector.broadcast %c128_i32 : i32 to vector<16x128xi32>
    %21 = arith.muli %18, %20 : vector<16x128xi32>
    %22 = vector.broadcast %17 : i32 to vector<16x128xi32>
    %23 = arith.addi %22, %21 : vector<16x128xi32>
    %24 = arith.addi %23, %19 : vector<16x128xi32>
    %c2048_i32_5 = arith.constant 2048 : i32
    %25 = vector.broadcast %c2048_i32_5 : i32 to vector<16x128xi32>
    %26 = arith.cmpi slt, %24, %25 : vector<16x128xi32>
    %cst_6 = arith.constant 0.000000e+00 : f32
    %27 = vector.broadcast %cst_6 : f32 to vector<16x128xf32>
    %28 = arith.select %26, %14, %27 : vector<16x128xi1>, vector<16x128xf32>
    %c0_7 = arith.constant 0 : index
    %c0_8 = arith.constant 0 : index
    %29 = vector.load %arg5[%c0_7, %c0_8] : memref<8x128xf32, #tpu.memory_space<vmem>>, vector<8x128xf32>
    %30 = vector.shape_cast %28 : vector<16x128xf32> to vector<2x8x128xf32>
    %cst_9 = arith.constant dense<0.000000e+00> : vector<8x128xf32>
    %31 = vector.multi_reduction <add>, %30, %cst_9 [0] : vector<2x8x128xf32> to vector<8x128xf32>
    %32 = arith.addf %29, %31 : vector<8x128xf32>
    %c0_10 = arith.constant 0 : index
    %c0_11 = arith.constant 0 : index
    %33 = vector.load %arg5[%c0_10, %c0_11] : memref<8x128xf32, #tpu.memory_space<vmem>>, vector<8x128xf32>
    tpu.vector_store %arg5[%c0_10, %c0_11], %32 {strides = array<i32>} : memref<8x128xf32, #tpu.memory_space<vmem>>, vector<8x128xf32>,
    %c0_i32_12 = arith.constant 0 : i32
    %34 = arith.cmpi eq, %arg1, %c0_i32_12 : i32
    %35 = arith.extui %34 : i1 to i32
    %c0_i32_13 = arith.constant 0 : i32
    %36 = arith.cmpi ne, %35, %c0_i32_13 : i32
    scf.if %36 {
      %c0_14 = arith.constant 0 : index
      %c0_15 = arith.constant 0 : index
      %37 = vector.load %arg5[%c0_14, %c0_15] : memref<8x128xf32, #tpu.memory_space<vmem>>, vector<8x128xf32>
      %c0_16 = arith.constant 0 : index
      %c0_17 = arith.constant 0 : index
      %c0_18 = arith.constant 0 : index
      %38 = vector.load %arg4[%c0_16, %c0_17, %c0_18] : memref<1x8x128xf32, #tpu.memory_space<vmem>>, vector<1x8x128xf32>
      %39 = vector.shape_cast %38 : vector<1x8x128xf32> to vector<8x128xf32>
      %40 = vector.shape_cast %37 : vector<8x128xf32> to vector<1x8x128xf32>
      tpu.vector_store %arg4[%c0_16, %c0_17, %c0_18], %40 {strides = array<i32>} : memref<1x8x128xf32, #tpu.memory_space<vmem>>, vector<1x8x128xf32>,
    } else {
    }
    return
  }
  func.func @transform_0(%arg0: i32, %arg1: i32) -> (i32, i32) {
    %c1_i32 = arith.constant 1 : i32
    %0 = arith.muli %arg0, %c1_i32 : i32
    %1 = arith.addi %0, %arg1 : i32
    %c0_i32 = arith.constant 0 : i32
    %2 = arith.minsi %1, %c0_i32 : i32
    %c0_i32_0 = arith.constant 0 : i32
    %c0_i32_1 = arith.constant 0 : i32
    return %2, %c0_i32_0 : i32, i32
  }
  func.func @transform_1(%arg0: i32, %arg1: i32) -> (i32, i32) {
    %c1_i32 = arith.constant 1 : i32
    %0 = arith.muli %arg0, %c1_i32 : i32
    %1 = arith.addi %0, %arg1 : i32
    %c0_i32 = arith.constant 0 : i32
    %2 = arith.minsi %1, %c0_i32 : i32
    %c0_i32_0 = arith.constant 0 : i32
    %c0_i32_1 = arith.constant 0 : i32
    return %2, %c0_i32_0 : i32, i32
  }
  func.func @transform_2(%arg0: i32, %arg1: i32) -> (i32, i32, i32) {
    %c0_i32 = arith.constant 0 : i32
    %c0_i32_0 = arith.constant 0 : i32
    %c0_i32_1 = arith.constant 0 : i32
    return %arg0, %c0_i32, %c0_i32_0 : i32, i32, i32
  }
}

</mosaic_0001>

<bundles_post_ra>
// kernel: focal_loss.1
= control target key start
LH: loop header
LB: loop body
LE: loop exit
PB: predicated region body
PF: predicated region fallthrough
CT: control target
= control target key end

     0   :  { %s447_s9 = smov 0   ;;  %s449_s10 = smov 0   ;;  %s490_s0 = inlined_call_operand.vmem [shape: f32[16,128], index: 0, kind: input, shape index: {}]   ;;  %s491_s1 = inlined_call_operand.vmem [shape: f32[16,128], index: 1, kind: input, shape index: {}]   ;;  %s492_s2 = inlined_call_operand.vmem [shape: f32[2,8,128], index: 2, kind: output, shape index: {}]  }
   0x1   :  { %s451_s11 = smov 0  }
   0x2 LB: > { %s24_s12 = sadd.s32 1, %s426_s10  ;;  %p367_p0 = scmp.ge.s32.totalorder %s430_s11, 1  ;;  %s430_s11 = sphi %s451_s11, %s12_s11   ;;  %s426_s10 = sphi %s449_s10, %s494_s10   ;;  %s422_s9 = sphi %s447_s9, %s493_s9  }
   0x3   : > { %p26_p1 = scmp.ge.s32.totalorder %s24_s12, 2  ;;  %p160_p2 = scmp.lt.s32.totalorder %s430_s11, 3 }
   0x5   : > { %s496_s12 = smov (%p26_p1, %s24_s12), 0  ;;  %p161_p3 = pnand %p367_p0, %p160_p2 }
   0x6   : > { %p193_p4 = scmp.lt.s32.totalorder (!%p161_p3), %s422_s9, 0  ;;  %s373_s19 = sshll.u32 (!%p161_p3), %s422_s9, 11 }
   0x7   : > { %164 = sbr.rel (%p161_p3) target bundleno = 53 (0x35), region = 28  ;;  %p216_p6 = scmp.lt.s32.totalorder (!%p161_p3), %s422_s9, 1 }
   0xc   : > { %s194_s13 = scalar_select %p193_p4, %s422_s9, 0  ;;  %v265_v3 = vlaneseq  ;;  %v272_v17 = vstv %s373_s19 }
   0xd   : > { %s500_s9 = smov (!%p216_p6, %s422_s9), 1 }
   0xe   : > { %s368_s14 = sshll.u32 %s194_s13, 1  ;;  %v266_v8 = vshrl.u32 %v265_v3, 7  ;;  %v269_v22 = vand.u32 127, %v265_v3  ;;  %s372_s23 = sshll.u32 %s500_s9, 3 }
   0xf   : > { %p196_p5 = scmp.lt.s32.totalorder %s368_s14, 1  ;;  %s219_s26 = scalar_lea.vmem %s492_s2, %s372_s23 }
  0x10   : > { %v267_v10 = vadd.s32 8, %v266_v8  ;;  %v270_v12 = vmul.u32 128, %v266_v8 }
  0x11   : > { %s498_s14 = smov (!%p196_p5, %s368_s14), 1 }
  0x12   : > { %s369_s15 = sshll.u32 %s498_s14, 3  ;;  %v271_v13 = vmul.u32 128, %v267_v10  ;;  %v273_v24 = vadd.s32 %v272_v17, %v270_v12 }
  0x13   : > { %s199_s18 = scalar_lea.vmem %s490_s0, %s369_s15  ;;  %s211_s22 = scalar_lea.vmem %s491_s1, %s369_s15 }
  0x14   : > { %v225_v0 = vld [vmem:[%s199_s18] sm:$0xff]  ;;  %v226_v1 = vld [vmem:[%s199_s18 + $0x8] sm:$0xff]  ;;  %v274_v25 = vadd.s32 %v272_v17, %v271_v13  ;;  %v275_v34 = vadd.s32 %v273_v24, %v269_v22 }
  0x15   : > { %v235_v2 = vand.u32 2147483647, %v225_v0  ;;  %v236_v4 = vand.u32 2147483647, %v226_v1  ;;  %v227_v18 = vld [vmem:[%s211_s22] sm:$0xff]  ;;  %v228_v21 = vld [vmem:[%s211_s22 + $0x8] sm:$0xff] }
  0x16   : > { %v229_v26 = vmax.f32 %v225_v0, 0.0  ;;  %v231_v27 = vmul.f32 %v227_v18, %v225_v0  ;;  %v230_v30 = vmax.f32 %v226_v1, 0.0  ;;  %v232_v31 = vmul.f32 %v228_v21, %v226_v1 }
  0x17   : > { %v237_v5 = vsub.f32 0.0, %v235_v2  ;;  %v238_v6 = vsub.f32 0.0, %v236_v4  ;;  %v276_v38 = vadd.s32 %v274_v25, %v269_v22  ;;  %vm277_vm2 = vcmp.lt.s32.totalorder %v275_v34, 2048 }
  0x18   : > { %v233_v36 = vsub.f32 %v229_v26, %v231_v27  ;;  %v234_v40 = vsub.f32 %v230_v30, %v232_v31 }
  0x19   : > { %v239_v7 = vmul.f32 1.442695, %v237_v5  ;;  %v241_v9 = vmul.f32 1.442695, %v238_v6  ;;  %vm278_vm3 = vcmp.lt.s32.totalorder %v276_v38, 2048 }
  0x1b   : > { %400 = vpow2.f32 %v239_v7 }
  0x1c   : > { %402 = vpow2.f32 %v241_v9 }
  0x21   : > { %v401_v11 = vpop.eup %400 }
  0x22   : > { %v403_v14 = vpop.eup %402  ;;  %v243_v15 = vadd.f32 1.0, %v401_v11  ;;  %v246_v16 = vmul.f32 -0.5, %v401_v11  ;;  %v249_v28 = vand.u32 2147483647, %v401_v11 }
  0x23   : > { %v252_v19 = vadd.f32 1.0, %v403_v14  ;;  %v255_v20 = vmul.f32 -0.5, %v403_v14  ;;  %v258_v32 = vand.u32 2147483647, %v403_v14 }
  0x24   : > { %404 = vlog2.f32 %v243_v15  ;;  %v247_v23 = vadd.f32 1.0, %v246_v16  ;;  %vm250_vm0 = vcmp.lt.f32.partialorder %v249_v28, 0.0004427343 }
  0x25   : > { %406 = vlog2.f32 %v252_v19  ;;  %v256_v29 = vadd.f32 1.0, %v255_v20  ;;  %vm259_vm1 = vcmp.lt.f32.partialorder %v258_v32, 0.0004427343 }
  0x26   : > { %v248_v33 = vmul.f32 %v401_v11, %v247_v23 }
  0x27   : > { %v257_v37 = vmul.f32 %v403_v14, %v256_v29 }
  0x2a   : > { %v405_v35 = vpop.eup %404 }
  0x2b   : > { %v407_v39 = vpop.eup %406  ;;  %v245_v41 = vmul.f32 0.6931472, %v405_v35 }
  0x2c   : > { %v254_v42 = vmul.f32 0.6931472, %v407_v39 }
  0x2d   : > { %v251_v43 = vsel %vm250_vm0, %v248_v33, %v245_v41 }
  0x2e   : > { %v260_v44 = vsel %vm259_vm1, %v257_v37, %v254_v42  ;;  %v261_v45 = vadd.f32 %v251_v43, %v233_v36 }
  0x2f   : > { %v262_v46 = vadd.f32 %v260_v44, %v234_v40 }
  0x30   : > { %v279_v47 = vsel %vm277_vm2, %v261_v45, 0.0 }
  0x31   : > { %v280_v48 = vsel %vm278_vm3, %v262_v46, 0.0 }
  0x32   : > { %v282_v49 = vadd.f32 %v280_v48, %v279_v47 }
  0x34   : > { %289 = vst [vmem:[%s219_s26] sm:$0xff] %v282_v49 }
  0x35 PF: > { %s12_s11 = sadd.s32 1, %s430_s11   ;;  %s493_s9 = smov %s426_s10 }
  0x36   : > { %p9_p7 = scmp.ge.s32.totalorder %s12_s11, 4   ;;  %s494_s10 = smov %s496_s12 }
  0x38   :  { %11 = sbr.rel (!%p9_p7) target bundleno = 2 (0x2), region = 69 }

</bundles_post_ra>
